<compile_context>
chip_gen: v7x
topology: tpu7x:2x2x1
jax: 0.10.0
libtpu: 0.0.40
codegen_flags: <defaults>
</compile_context>

<pallas_src>
import jax
import jax.numpy as jnp
from jax import lax
from jax.experimental import pallas as pl
from jax.experimental.pallas import tpu as pltpu


def adain_kernel(x_ref, gamma_ref, beta_ref, o_ref):
    # x_ref: (C_TILE, HW)   gamma_ref/beta_ref: (C_TILE, 1)   o_ref: (C_TILE, HW)
    x = x_ref[...].astype(jnp.float32)
    inv_hw = jnp.float32(1.0 / x.shape[-1])

    # One pass over the block: sum and sum-of-squares (per-channel, over HW).
    sum_x = jnp.sum(x, axis=-1, keepdims=True)          # (C_TILE, 1)
    sum_x2 = jnp.sum(x * x, axis=-1, keepdims=True)     # (C_TILE, 1)
    mean = sum_x * inv_hw
    var = sum_x2 * inv_hw - mean * mean                  # biased variance

    inv_std = lax.rsqrt(var + jnp.float32(1e-5))         # (C_TILE, 1)

    # Fold InstanceNorm + AdaIN modulation into one scale/shift FMA.
    gamma = gamma_ref[...].astype(jnp.float32)           # (C_TILE, 1)
    beta = beta_ref[...].astype(jnp.float32)             # (C_TILE, 1)
    scale = (1.0 + gamma) * inv_std                      # (C_TILE, 1)
    shift = beta - mean * scale                          # (C_TILE, 1)

    o_ref[...] = (x * scale + shift).astype(o_ref.dtype)


def _pick_c_tile(C, HW, itemsize, target_bytes=2 * 1024 * 1024):
    """Largest power-of-two multiple-of-8 divisor of C with block <= target."""
    if C % 8 != 0:
        return C  # small / odd channel count: full-dim block satisfies tiling rule
    best = 8
    ct = 8
    while ct <= C:
        if C % ct == 0 and ct * HW * itemsize <= target_bytes:
            best = ct
        ct *= 2
    return best


def adain_forward(x, s, fc_weight, fc_bias, eps=1e-5):
    """x: (N, C, H, W), s: (N, D), fc_weight: (2C, D), fc_bias: (2C,)."""
    N, C, H, W = x.shape
    HW = H * W

    # --- Style FC hoisted out of the kernel (tiny GEMM, done once in XLA). ---
    h = (s.astype(jnp.float32) @ fc_weight.astype(jnp.float32).T
         + fc_bias.astype(jnp.float32))                  # (N, 2C)
    gamma = h[:, :C].reshape(N, C, 1)
    beta = h[:, C:].reshape(N, C, 1)

    x_flat = x.reshape(N, C, HW)
    itemsize = jnp.dtype(x.dtype).itemsize
    c_tile = _pick_c_tile(C, HW, itemsize)

    block_bytes = c_tile * HW * itemsize
    # 2x double-buffered input + 2x output + small gamma/beta, with headroom.
    vmem_budget = int(min(max(6 * block_bytes, 16 * 1024 * 1024),
                          48 * 1024 * 1024))

    cost = pl.CostEstimate(
        flops=6 * N * C * HW,
        transcendentals=N * C,
        bytes_accessed=2 * N * C * HW * itemsize + 2 * N * C * 4,
    )

    out_flat = pl.pallas_call(
        adain_kernel,
        out_shape=jax.ShapeDtypeStruct((N, C, HW), x.dtype),
        grid_spec=pltpu.PrefetchScalarGridSpec(
            num_scalar_prefetch=0,
            grid=(N, C // c_tile),
            in_specs=[
                pl.BlockSpec((pl.Squeezed(), c_tile, HW), lambda n, c: (n, c, 0)),  # x
                pl.BlockSpec((pl.Squeezed(), c_tile, 1), lambda n, c: (n, c, 0)),   # gamma
                pl.BlockSpec((pl.Squeezed(), c_tile, 1), lambda n, c: (n, c, 0)),   # beta
            ],
            out_specs=pl.BlockSpec((pl.Squeezed(), c_tile, HW),
                                   lambda n, c: (n, c, 0)),
        ),
        compiler_params=pltpu.CompilerParams(
            dimension_semantics=("parallel", "parallel"),
            vmem_limit_bytes=vmem_budget,
        ),
        cost_estimate=cost,
    )(x_flat, gamma, beta)

    return out_flat.reshape(N, C, H, W)


def adain_reference(x, s, fc_weight, fc_bias, eps=1e-5):
    """Pure-JAX reference matching PyTorch AdaIN semantics."""
    N, C, H, W = x.shape
    h = s @ fc_weight.T + fc_bias                        # (N, 2C)
    gamma = h[:, :C][:, :, None, None]
    beta = h[:, C:][:, :, None, None]
    mean = jnp.mean(x, axis=(2, 3), keepdims=True)
    var = jnp.mean((x - mean) ** 2, axis=(2, 3), keepdims=True)
    xhat = (x - mean) / jnp.sqrt(var + eps)
    return (1.0 + gamma) * xhat + beta


if __name__ == "__main__":
    # Small shapes consistent with the module: batch=2, channels=4, 16x16
    # spatial, style_dim=8.
    N, C, H, W = 2, 4, 16, 16
    style_dim = 8

    key = jax.random.PRNGKey(0)
    kx, ks, kw, kb = jax.random.split(key, 4)

    x = jax.random.normal(kx, (N, C, H, W), dtype=jnp.float32)
    s = jax.random.normal(ks, (N, style_dim), dtype=jnp.float32)

    # nn.Linear(style_dim, 2*C) parameter shapes.
    fc_weight = jax.random.normal(kw, (2 * C, style_dim), dtype=jnp.float32) * 0.1
    fc_bias = jax.random.normal(kb, (2 * C,), dtype=jnp.float32) * 0.1

    out = adain_forward(x, s, fc_weight, fc_bias)
    out = jax.block_until_ready(out)

    ref = adain_reference(x, s, fc_weight, fc_bias)
    assert out.shape == (N, C, H, W)
    assert jnp.allclose(out, ref, atol=1e-4, rtol=1e-4), "mismatch vs reference"

    print("KERNEL_OK")
</pallas_src>

<mosaic_0001>
module attributes {stable_mosaic.version = 11 : i64} {
  func.func @adain_kernel(%arg0: i32, %arg1: i32, %arg2: memref<1x4x256xf32, #tpu.memory_space<vmem>>, %arg3: memref<1x4x1xf32, #tpu.memory_space<vmem>>, %arg4: memref<1x4x1xf32, #tpu.memory_space<vmem>>, %arg5: memref<1x4x256xf32, #tpu.memory_space<vmem>>) attributes {dimension_semantics = [#tpu.dimension_semantics<parallel>, #tpu.dimension_semantics<parallel>], iteration_bounds = array<i64: 2, 1>, scalar_prefetch = 0 : i64, scratch_operands = 0 : i64, tpu.core_type = #tpu.core_type<tc>, window_params = [{transform_indices = @transform_0, window_bounds = array<i64: 1, 4, 256>}, {transform_indices = @transform_1, window_bounds = array<i64: 1, 4, 1>}, {transform_indices = @transform_2, window_bounds = array<i64: 1, 4, 1>}, {transform_indices = @transform_3, window_bounds = array<i64: 1, 4, 256>}]} {
    %c0 = arith.constant 0 : index
    %c0_0 = arith.constant 0 : index
    %c0_1 = arith.constant 0 : index
    %0 = vector.load %arg2[%c0, %c0_0, %c0_1] : memref<1x4x256xf32, #tpu.memory_space<vmem>>, vector<1x4x256xf32>
    %1 = vector.shape_cast %0 : vector<1x4x256xf32> to vector<4x256xf32>
    %cst = arith.constant dense<0.000000e+00> : vector<4xf32>
    %2 = vector.multi_reduction <add>, %1, %cst [1] : vector<4x256xf32> to vector<4xf32>
    %3 = vector.shape_cast %2 : vector<4xf32> to vector<4x1xf32>
    %4 = arith.mulf %1, %1 : vector<4x256xf32>
    %cst_2 = arith.constant dense<0.000000e+00> : vector<4xf32>
    %5 = vector.multi_reduction <add>, %4, %cst_2 [1] : vector<4x256xf32> to vector<4xf32>
    %6 = vector.shape_cast %5 : vector<4xf32> to vector<4x1xf32>
    %cst_3 = arith.constant 3.906250e-03 : f32
    %7 = vector.broadcast %cst_3 : f32 to vector<4x1xf32>
    %8 = arith.mulf %3, %7 : vector<4x1xf32>
    %cst_4 = arith.constant 3.906250e-03 : f32
    %9 = vector.broadcast %cst_4 : f32 to vector<4x1xf32>
    %10 = arith.mulf %6, %9 : vector<4x1xf32>
    %11 = arith.mulf %8, %8 : vector<4x1xf32>
    %12 = arith.subf %10, %11 : vector<4x1xf32>
    %cst_5 = arith.constant 9.99999974E-6 : f32
    %13 = vector.broadcast %cst_5 : f32 to vector<4x1xf32>
    %14 = arith.addf %12, %13 : vector<4x1xf32>
    %15 = math.rsqrt %14 : vector<4x1xf32>
    %c0_6 = arith.constant 0 : index
    %c0_7 = arith.constant 0 : index
    %c0_8 = arith.constant 0 : index
    %16 = vector.load %arg3[%c0_6, %c0_7, %c0_8] : memref<1x4x1xf32, #tpu.memory_space<vmem>>, vector<1x4x1xf32>
    %17 = vector.shape_cast %16 : vector<1x4x1xf32> to vector<4x1xf32>
    %c0_9 = arith.constant 0 : index
    %c0_10 = arith.constant 0 : index
    %c0_11 = arith.constant 0 : index
    %18 = vector.load %arg4[%c0_9, %c0_10, %c0_11] : memref<1x4x1xf32, #tpu.memory_space<vmem>>, vector<1x4x1xf32>
    %19 = vector.shape_cast %18 : vector<1x4x1xf32> to vector<4x1xf32>
    %cst_12 = arith.constant 1.000000e+00 : f32
    %20 = vector.broadcast %cst_12 : f32 to vector<4x1xf32>
    %21 = arith.addf %20, %17 : vector<4x1xf32>
    %22 = arith.mulf %21, %15 : vector<4x1xf32>
    %23 = arith.mulf %8, %22 : vector<4x1xf32>
    %24 = arith.subf %19, %23 : vector<4x1xf32>
    %25 = vector.broadcast %22 : vector<4x1xf32> to vector<4x256xf32>
    %26 = arith.mulf %1, %25 : vector<4x256xf32>
    %27 = vector.broadcast %24 : vector<4x1xf32> to vector<4x256xf32>
    %28 = arith.addf %26, %27 : vector<4x256xf32>
    %c0_13 = arith.constant 0 : index
    %c0_14 = arith.constant 0 : index
    %c0_15 = arith.constant 0 : index
    %29 = vector.load %arg5[%c0_13, %c0_14, %c0_15] : memref<1x4x256xf32, #tpu.memory_space<vmem>>, vector<1x4x256xf32>
    %30 = vector.shape_cast %29 : vector<1x4x256xf32> to vector<4x256xf32>
    %31 = vector.shape_cast %28 : vector<4x256xf32> to vector<1x4x256xf32>
    tpu.vector_store %arg5[%c0_13, %c0_14, %c0_15], %31 {strides = array<i32>} : memref<1x4x256xf32, #tpu.memory_space<vmem>>, vector<1x4x256xf32>,
    return
  }
  func.func @transform_0(%arg0: i32, %arg1: i32) -> (i32, i32, i32) {
    %c0_i32 = arith.constant 0 : i32
    %c0_i32_0 = arith.constant 0 : i32
    return %arg0, %arg1, %c0_i32 : i32, i32, i32
  }
  func.func @transform_1(%arg0: i32, %arg1: i32) -> (i32, i32, i32) {
    %c0_i32 = arith.constant 0 : i32
    %c0_i32_0 = arith.constant 0 : i32
    return %arg0, %arg1, %c0_i32 : i32, i32, i32
  }
  func.func @transform_2(%arg0: i32, %arg1: i32) -> (i32, i32, i32) {
    %c0_i32 = arith.constant 0 : i32
    %c0_i32_0 = arith.constant 0 : i32
    return %arg0, %arg1, %c0_i32 : i32, i32, i32
  }
  func.func @transform_3(%arg0: i32, %arg1: i32) -> (i32, i32, i32) {
    %c0_i32 = arith.constant 0 : i32
    %c0_i32_0 = arith.constant 0 : i32
    return %arg0, %arg1, %c0_i32 : i32, i32, i32
  }
}

</mosaic_0001>

<bundles_post_ra>
// kernel: tpu_custom_call.1
= control target key start
LH: loop header
LB: loop body
LE: loop exit
PB: predicated region body
PF: predicated region fallthrough
CT: control target
= control target key end

     0   :  { %8 = vsyncpa [#allocation3], 0  ;;  %s741_s0 = inlined_call_operand.vmem [shape: f32[2,4,256], index: 0, kind: input, shape index: {}]   ;;  %s742_s1 = inlined_call_operand.vmem [shape: f32[2,4,1], index: 1, kind: input, shape index: {}]   ;;  %s743_s2 = inlined_call_operand.vmem [shape: f32[2,4,1], index: 2, kind: input, shape index: {}]   ;;  %s744_s3 = inlined_call_operand.hbm [shape: f32[2,4,256], index: 3, kind: output, shape index: {}]  }
   0x1   :  { %10 = vsyncpa [#allocation3 + $0x1], 0  ;;  %s619_s12 = smov 0   ;;  %s621_s13 = smov 0  }
   0x2   :  { %s623_s14 = smov 0   ;;  %s625_s15 = smov 0  }
   0x3   :  { %s627_s16 = smov 0   ;;  %s629_s17 = smov 0  }
   0x4 LB: > { %s437_s18 = sadd.s32 4294967295, %s594_s17   ;;  %s438_s19 = sadd.s32 4294967294, %s594_s17   ;;  %s594_s17 = sphi %s629_s17, %s16_s17   ;;  %s590_s16 = sphi %s627_s16, %s751_s16   ;;  %s586_s15 = sphi %s625_s15, %s750_s15   ;;  %s582_s14 = sphi %s623_s14, %s749_s14   ;;  %s578_s13 = sphi %s621_s13, %s748_s13   ;;  %s574_s12 = sphi %s619_s12, %s747_s12  }
   0x5   : > { %s28_s20 = sadd.s32 1, %s590_s16  ;;  %s121_s21 = sadd.s32 1, %s582_s14 }
   0x6   : > { %p30_p0 = scmp.ge.s32.totalorder %s28_s20, 2  ;;  %p131_p1 = scmp.ne.s32.totalorder %s582_s14, %s578_s13 }
   0x7   : > { %p132_p2 = scmp.eq.s32.totalorder %s437_s18, 1  ;;  %p137_p3 = scmp.ne.s32.totalorder %s578_s13, %s574_s12 }
   0x8   : > { %s753_s20 = smov (%p30_p0, %s28_s20), 0  ;;  %p138_p5 = scmp.eq.s32.totalorder %s438_s19, 1 }
   0x9   : > { %p659_p4 = por %p132_p2, %p131_p1  ;;  %s116_s23 = ssub.s32 %s590_s16, %s753_s20 }
   0xa   : > { %p441_p6 = scmp.ge.s32.totalorder %s594_s17, 1  ;;  %p119_p7 = scmp.eq.s32.totalorder %s116_s23, 0 }
   0xb   : > { %p666_p8 = por %p138_p5, %p137_p3  ;;  %p188_p9 = scmp.lt.s32.totalorder %s594_s17, 3 }
   0xc   : > { %s672_s25 = scalar_select %p119_p7, %s582_s14, %s121_s21  }
   0xd   : > { %p189_p10 = pnand %p441_p6, %p188_p9 }
   0xe   : > { %p230_p11 = scmp.lt.s32.totalorder (!%p189_p10), %s586_s15, 1  ;;  %vm257_vm0 = vcmask (!%p189_p10), 1043456   ;;  %v596_v10 = vmov (!%p189_p10), 0   ;;  %v597_v25 = vmov (!%p189_p10), 839922192   ;;  %v291_v27 = vlaneseq (!%p189_p10)  ;;  %s227_s11 = sand.u32 (!%p189_p10), 1, %s578_s13  }
   0xf   : > { %192 = sbr.rel (%p189_p10) target bundleno = 347 (0x15b), region = 32  ;;  %511 = vset.pattern.permute.xlu1 (!%p189_p10), %v596_v10  ;;  %512 = vset.pattern.permute.xlu0 (!%p189_p10), %v596_v10  ;;  %v289_v26 = vunpack.c.l.s4 (!%p189_p10), %v597_v25  ;;  %s442_s18 = sshll.u32 (!%p189_p10), %s227_s11, 3 }
  0x10   : > { %v292_v29 = vshrl.u32 (!%p189_p10), %v291_v27, 7  ;;  %s453_s19 = sshll.u32 (!%p189_p10), %s586_s15, 7  ;;  %s229_s21 = scalar_lea.vmem (!%p189_p10), [#allocation2], %s442_s18 }
  0x11   : > { %v290_v28 = vunpack.c.0.s8 (!%p189_p10), %v289_v26  ;;  %s328_s23 = sshll.u32 (!%p189_p10), %s229_s21, 4  ;;  %s694_s28 = scalar_lea.hbm (!%p189_p10), %s744_s3, %s453_s19  ;;  %s696_s23 = int_to_ptr.vmem [resolvable:$true] %s328_s23 }
  0x12   : > { %s312_s29 = scalar_lea.sflag (!%p189_p10), [#allocation3], %s227_s11 }
  0x13   : > { %v293_v30 = vsub.s32 (!%p189_p10), %v290_v28, %v292_v29 }
  0x16   : > { %s676_s26 = scalar_select %p230_p11, %s586_s15, 1 }
  0x17   : > { %s598_s15 = smov [#allocation2]  }
  0x18   : > { %s452_s27 = sshll.u32 %s676_s26, 3  ;;  %s445_s4 = sshll.u32 %s676_s26, 2 }
  0x19   : > { %s238_s30 = scalar_lea.vmem %s741_s0, %s452_s27  ;;  %s245_s7 = scalar_lea.vmem %s742_s1, %s445_s4 }
  0x1a   : > { %v253_v0 = vld [vmem:[%s238_s30] sm:$0xff]  ;;  %s252_s10 = scalar_lea.vmem %s743_s2, %s445_s4  ;;  %s516_s30 = scalar_lea.vmem %s696_s23, 128 }
  0x1b   : > { %v255_v1 = vcombine.high %v253_v0, %v253_v0  ;;  %v258_v2 = vsel %vm257_vm0, %v253_v0, 0.0  ;;  %v263_v3 = vmul.f32 %v253_v0, %v253_v0  ;;  %v278_v18 = vld [vmem:[%s245_s7] sm:$0xf]  ;;  %p517_p12 = scmp.ne.s32.totalorder %s696_s23, %s516_s30  ;;  %s520_s4 = sshll.u32 %s598_s15, 4  ;;  %s521_s4 = int_to_ptr.vmem [resolvable:$false] %s520_s4 }
  0x1c   : > { %v280_v19 = vadd.f32 1.0, %v278_v18  ;;  %v279_v22 = vld [vmem:[%s252_s10] sm:$0xf]  ;;  %s522_s5 = scalar_lea.vmem %s521_s4, 256  ;;  %p523_p1 = scmp.lt.s32.totalorder %s696_s23, %s521_s4 }
  0x1d   : > { %v259_v4 = vsel %vm257_vm0, %v255_v1, 0.0  ;;  %v265_v5 = vcombine.high %v263_v3, %v263_v3  ;;  %v267_v6 = vsel %vm257_vm0, %v263_v3, 0.0  ;;  %p518_p13 = pnand %p517_p12, %p659_p4  ;;  %p524_p2 = scmp.lt.s32.totalorder %s522_s5, %s516_s30 }
  0x1e   : > { %v260_v7 = vadd.f32 %v259_v4, %v258_v2 }
  0x1f   : > { %v268_v8 = vsel %vm257_vm0, %v265_v5, 0.0  ;;  %p519_p0 = pneg %p518_p13  ;;  %p525_p3 = por %p524_p2, %p523_p1 }
  0x20   : > { %261 = vadd.xlane.f32.xlu0 %v260_v7  ;;  %v269_v9 = vadd.f32 %v268_v8, %v267_v6 }
  0x21   : > { %p526_p5 = pnand %p525_p3, %p519_p0 }
  0x24   : > { %270 = vadd.xlane.f32.xlu0 %v269_v9 }
  0xad   : > { %v262_v11 = vpop.xlane.xlu0 %261 }
  0xae   : > { %v272_v12 = vmul.f32 0.00390625, %v262_v11 }
  0xb0   : > { %v274_v14 = vmul.f32 %v272_v12, %v272_v12 }
  0xb1   : > { %v271_v13 = vpop.xlane.xlu0 %270 }
  0xb2   : > { %v273_v15 = vmul.f32 0.00390625, %v271_v13 }
  0xb4   : > { %v275_v16 = vsub.f32 %v273_v15, %v274_v14 }
  0xb6   : > { %v276_v17 = vadd.f32 1e-05, %v275_v16 }
  0xb8   : > { %514 = vrsqrt.f32 %v276_v17 }
  0xc2   : > { %v515_v20 = vpop.eup %514 }
  0xc3   : > { %v281_v21 = vmul.f32 %v515_v20, %v280_v19 }
  0xc5   : > { %286 = vperm.xlu1 %511, %v281_v21   ;;  %v282_v23 = vmul.f32 %v281_v21, %v272_v12 }
  0xc7   : > { %v283_v24 = vsub.f32 %v279_v22, %v282_v23 }
  0xc9   : > { %299 = vperm.xlu1 %511, %v283_v24  }
 0x144   : > { %v287_v31 = vpop.permute.xlu1 %286 }
 0x145   : > { %v294_v32 = vrot.slane %v287_v31, %v293_v30 }
 0x147   : > { %v296_v34 = vmul.f32 %v294_v32, %v253_v0 }
 0x148   : > { %v300_v33 = vpop.permute.xlu1 %299 }
 0x149   : > { %v307_v35 = vrot.slane %v300_v33, %v293_v30 }
 0x14b   : > { %v309_v36 = vadd.f32 %v307_v35, %v296_v34 }
 0x14d   : > { %310 = vst [vmem:[%s229_s21] sm:$0xff] %v309_v36 }
 0x14e   : > { %529 = shalt.err (!%p526_p5)
}
 0x14f   : > { %s530_s6 = scalar_lea.hbm %s694_s28, 128  ;;  %s534_s9 = scalar_lea.hbm %s744_s3, 256 }
 0x150   : > { %p531_p6 = scmp.ne.s32.totalorder %s694_s28, %s530_s6  ;;  %p535_p10 = scmp.lt.u32.totalorder %s694_s28, %s744_s3 }
 0x151   : > { %p536_p11 = scmp.lt.u32.totalorder %s534_s9, %s530_s6  ;;  %p538_p13 = scmp.lt.u32.totalorder %s530_s6, %s694_s28 }
 0x152   : > { %p532_p7 = pnand %p531_p6, %p659_p4 }
 0x153   : > { %p537_p12 = por %p536_p11, %p535_p10 }
 0x154   : > { %p533_p9 = pneg %p532_p7 }
 0x155   : > { %p539_p0 = por %p538_p13, %p537_p12 }
 0x157   : > { %p540_p1 = pnand %p539_p0, %p533_p9 }
 0x159   : > { %543 = shalt.err (!%p540_p1)
}
 0x15a   : > { %454 = dma.vmem_to_hbm [thread:$0]  (%p659_p4), %s696_s23, 128, %s694_s28, %s312_s29  }
 0x15b PF: > { %p460_p2 = scmp.ge.s32.totalorder %s594_s17, 2  ;;  %s340_s18 = sand.u32 1, %s574_s12  }
 0x15c   : > { %s341_s19 = scalar_lea.sflag [#allocation3], %s340_s18 }
 0x15d   : > { %p457_p3 = pnand %p460_p2, %p666_p8 }
 0x15f   : > { %569 = dma.done.wait (!%p457_p3), %s341_s19, 128  }
 0x160   : > { %571 = vsyncadd (!%p457_p3), %s341_s19, 4294967168  ;;  %s16_s17 = sadd.s32 1, %s594_s17   ;;  %s747_s12 = smov %s578_s13 }
 0x161   : > { %p13_p5 = scmp.ge.s32.totalorder %s16_s17, 4   ;;  %s748_s13 = smov %s582_s14 }
 0x162   : > { %s749_s14 = smov %s672_s25  ;;  %s750_s15 = smov %s590_s16 }
 0x163   : > { %s751_s16 = smov %s753_s20  ;;  %15 = sbr.rel (!%p13_p5) target bundleno = 4 (0x4), region = 73 }
 0x16a   :  { %346 = vsyncpa [#allocation3], 1 }
 0x16b   :  { %348 = vsyncpa [#allocation3 + $0x1], 1 }

</bundles_post_ra>
